<compile_context>
chip_gen: v7x
topology: tpu7x:2x2x1
jax: 0.10.0
libtpu: 0.0.40
codegen_flags: <defaults>
</compile_context>

<pallas_src>
import jax
import jax.numpy as jnp
from jax.experimental import pallas as pl
from jax.experimental.pallas import tpu as pltpu

N_PAD = 128    # lane-dense output width (>= n_actions, multiple of 128)
TM_CAP = 2048  # max rows per grid step


def _round_up(a, m):
    return ((a + m - 1) // m) * m


def _mlp_kernel(x_ref, w1_ref, b1_ref, w2_ref, b2_ref, wf_ref, bf_ref, o_ref):
    """Fused relu(x@W1+b1) -> relu(.@W2+b2) -> .@Wf+bf   (f32 accumulation)."""
    x = x_ref[...].astype(jnp.bfloat16)                       # f32 tile -> bf16 (VPU)
    # fc1 + relu
    h = jnp.dot(x, w1_ref[...], preferred_element_type=jnp.float32) + b1_ref[...]
    h = jnp.maximum(h, 0.0)
    # hidden[0] + relu
    h = jnp.dot(h.astype(jnp.bfloat16), w2_ref[...],
                preferred_element_type=jnp.float32) + b2_ref[...]
    h = jnp.maximum(h, 0.0)
    # fc_final (no activation) -> lane-dense (TM, 128) bf16 store
    y = jnp.dot(h.astype(jnp.bfloat16), wf_ref[...],
                preferred_element_type=jnp.float32) + bf_ref[...]
    o_ref[...] = y.astype(o_ref.dtype)


def prepare_params(params):
    """One-time parameter prep (do this at param creation / target-net update).

    params: (w1, b1, w2, b2, wf, bf) with weights (in, out), biases (1, out).
    Returns (prepared_params, n_actions): weights cast to bf16, biases to f32,
    final layer zero-padded to N_PAD output lanes for unmasked lane-dense stores.
    """
    w1, b1, w2, b2, wf, bf = params
    n_actions = wf.shape[1]
    wf_p = jnp.zeros((wf.shape[0], N_PAD), jnp.float32).at[:, :n_actions].set(wf)
    bf_p = jnp.zeros((1, N_PAD), jnp.float32).at[:, :n_actions].set(bf)
    prepared = (
        w1.astype(jnp.bfloat16), b1.astype(jnp.float32),
        w2.astype(jnp.bfloat16), b2.astype(jnp.float32),
        wf_p.astype(jnp.bfloat16), bf_p.astype(jnp.float32),
    )
    return prepared, n_actions


def custom_linear_dqn_forward(x, prepared_params, n_actions):
    """Pallas forward for CustomLinearDQN with hidden units (64, 64), relu/relu.

    x: any shape whose element count is divisible by n_features
    prepared_params: output of prepare_params()
    """
    w1, b1, w2, b2, wf, bf = prepared_params
    n_features = w1.shape[0]

    # Glue: equivalent of x.view(-1, self.n_features)
    assert x.size % n_features == 0, "flattened input not divisible by n_features"
    x2d = jnp.reshape(x, (-1, n_features)).astype(jnp.float32)  # no-op if already f32
    batch = x2d.shape[0]

    # ---- batch tiling --------------------------------------------------------
    # 16-granular (bf16 sublane pack for the output tile; 8 would suffice for
    # the f32 input tile).  At least 2 grid steps whenever the padded batch has
    # >= 32 rows so both v7x TensorCores get work; cap TM at 2048 rows
    # (~256 KiB f32 x tile + 512 KiB bf16 out tile, double-buffered ~2 MiB).
    batch_16 = _round_up(max(batch, 1), 16)
    n_steps = max(2 if batch_16 >= 32 else 1, pl.cdiv(batch_16, TM_CAP))
    TM = _round_up(pl.cdiv(batch_16, n_steps), 16)
    batch_p = n_steps * TM
    if batch_p != batch:
        x2d = jnp.pad(x2d, ((0, batch_p - batch), (0, 0)))

    def resident(shape):
        # Weights/biases: same block every grid step -> stay VMEM-resident.
        return pl.BlockSpec(shape, lambda i: (0,) * len(shape))

    out = pl.pallas_call(
        _mlp_kernel,
        out_shape=jax.ShapeDtypeStruct((batch_p, N_PAD), jnp.bfloat16),
        grid=(n_steps,),
        in_specs=[
            pl.BlockSpec((TM, n_features), lambda i: (i, 0)),
            resident(w1.shape), resident(b1.shape),
            resident(w2.shape), resident(b2.shape),
            resident(wf.shape), resident(bf.shape),
        ],
        out_specs=pl.BlockSpec((TM, N_PAD), lambda i: (i, 0)),
        compiler_params=pltpu.CompilerParams(
            dimension_semantics=("parallel",),
        ),
    )(x2d, w1, b1, w2, b2, wf, bf)

    # Strip batch padding and lane padding; return f32 Q-values (tiny cast:
    # only batch x n_actions elements).  Note: values carry bf16 rounding.
    return out[:batch, :n_actions].astype(jnp.float32)


def init_params(key, n_features, n_actions, n_hidden=(64, 64)):
    """PyTorch-style init: U(-1/sqrt(fan_in), 1/sqrt(fan_in)); weights (in, out)."""
    sizes = [n_features] + list(n_hidden) + [n_actions]
    params = []
    for fan_in, fan_out in zip(sizes[:-1], sizes[1:]):
        key, kw, kb = jax.random.split(key, 3)
        bound = 1.0 / jnp.sqrt(jnp.float32(fan_in))
        w = jax.random.uniform(kw, (fan_in, fan_out), jnp.float32, -bound, bound)
        b = jax.random.uniform(kb, (1, fan_out), jnp.float32, -bound, bound)
        params.extend([w, b])
    return tuple(params)


def reference_forward_bf16(x, params):
    """Pure-JAX reference mirroring the kernel's bf16/f32 numerics (incl. bf16 out)."""
    w1, b1, w2, b2, wf, bf = params
    h = jnp.reshape(x, (-1, w1.shape[0])).astype(jnp.bfloat16)
    h = jnp.dot(h, w1.astype(jnp.bfloat16), preferred_element_type=jnp.float32) + b1
    h = jnp.maximum(h, 0.0)
    h = jnp.dot(h.astype(jnp.bfloat16), w2.astype(jnp.bfloat16),
                preferred_element_type=jnp.float32) + b2
    h = jnp.maximum(h, 0.0)
    y = jnp.dot(h.astype(jnp.bfloat16), wf.astype(jnp.bfloat16),
                preferred_element_type=jnp.float32) + bf
    return y.astype(jnp.bfloat16).astype(jnp.float32)


def reference_forward_f32(x, params):
    """Pure-f32 reference (mirrors the PyTorch forward semantics)."""
    w1, b1, w2, b2, wf, bf = params
    h = jnp.reshape(x, (-1, w1.shape[0])).astype(jnp.float32)
    h = jnp.maximum(h @ w1 + b1, 0.0)
    h = jnp.maximum(h @ w2 + b2, 0.0)
    return h @ wf + bf


if __name__ == "__main__":
    key = jax.random.PRNGKey(0)
    n_features = 32
    n_actions = 4

    kp, kx = jax.random.split(key)
    params = init_params(kp, n_features, n_actions)
    prepared, n_act = prepare_params(params)   # one-time, outside the hot loop

    # (2, 4, 16, 16) -> 2048 elements -> view(-1, 32) -> (64, 32) rows.
    x = jax.random.normal(kx, (2, 4, 16, 16), jnp.float32)

    out = custom_linear_dqn_forward(x, prepared, n_act)
    out = jax.block_until_ready(out)

    assert out.shape == (64, n_actions), out.shape

    # Check vs a reference with identical bf16/f32 numerics (incl. bf16 output).
    ref_bf16 = reference_forward_bf16(x, params)
    assert jnp.allclose(out, ref_bf16, atol=2e-2, rtol=2e-2), "mismatch vs bf16 reference"

    # Loose check vs the pure-f32 PyTorch-equivalent forward (bf16 rounding).
    ref_f32 = reference_forward_f32(x, params)
    assert jnp.allclose(out, ref_f32, atol=7e-2, rtol=7e-2), "mismatch vs f32 reference"

    print("KERNEL_OK")
</pallas_src>

<mosaic_0001>
module attributes {stable_mosaic.version = 11 : i64} {
  func.func @_mlp_kernel(%arg0: i32, %arg1: memref<32x32xf32, #tpu.memory_space<vmem>>, %arg2: memref<32x64xbf16, #tpu.memory_space<vmem>>, %arg3: memref<1x64xf32, #tpu.memory_space<vmem>>, %arg4: memref<64x64xbf16, #tpu.memory_space<vmem>>, %arg5: memref<1x64xf32, #tpu.memory_space<vmem>>, %arg6: memref<64x128xbf16, #tpu.memory_space<vmem>>, %arg7: memref<1x128xf32, #tpu.memory_space<vmem>>, %arg8: memref<32x128xbf16, #tpu.memory_space<vmem>>) attributes {dimension_semantics = [#tpu.dimension_semantics<parallel>], iteration_bounds = array<i64: 2>, scalar_prefetch = 0 : i64, scratch_operands = 0 : i64, tpu.core_type = #tpu.core_type<tc>, window_params = [{transform_indices = @transform_0, window_bounds = array<i64: 32, 32>}, {pipeline_mode = #tpu.pipeline_mode<synchronous>, transform_indices = @transform_1, window_bounds = array<i64: 32, 64>}, {pipeline_mode = #tpu.pipeline_mode<synchronous>, transform_indices = @transform_2, window_bounds = array<i64: 1, 64>}, {pipeline_mode = #tpu.pipeline_mode<synchronous>, transform_indices = @transform_3, window_bounds = array<i64: 64, 64>}, {pipeline_mode = #tpu.pipeline_mode<synchronous>, transform_indices = @transform_4, window_bounds = array<i64: 1, 64>}, {pipeline_mode = #tpu.pipeline_mode<synchronous>, transform_indices = @transform_5, window_bounds = array<i64: 64, 128>}, {pipeline_mode = #tpu.pipeline_mode<synchronous>, transform_indices = @transform_6, window_bounds = array<i64: 1, 128>}, {transform_indices = @transform_7, window_bounds = array<i64: 32, 128>}]} {
    %c0 = arith.constant 0 : index
    %c0_0 = arith.constant 0 : index
    %0 = vector.load %arg1[%c0, %c0_0] : memref<32x32xf32, #tpu.memory_space<vmem>>, vector<32x32xf32>
    %1 = arith.truncf %0 : vector<32x32xf32> to vector<32x32xbf16>
    %c0_1 = arith.constant 0 : index
    %c0_2 = arith.constant 0 : index
    %2 = vector.load %arg2[%c0_1, %c0_2] : memref<32x64xbf16, #tpu.memory_space<vmem>>, vector<32x64xbf16>
    %cst = arith.constant dense<0.000000e+00> : vector<32x64xf32>
    %3 = tpu.matmul %1, %2, %cst {dimension_numbers = #tpu.dot_dimension_numbers<[1], [0], [0], [1], [0, 0, 1, 1], [], []>} : vector<32x32xbf16>, vector<32x64xbf16>, vector<32x64xf32> -> vector<32x64xf32>
    %c0_3 = arith.constant 0 : index
    %c0_4 = arith.constant 0 : index
    %4 = vector.load %arg3[%c0_3, %c0_4] : memref<1x64xf32, #tpu.memory_space<vmem>>, vector<1x64xf32>
    %5 = vector.broadcast %4 : vector<1x64xf32> to vector<32x64xf32>
    %6 = arith.addf %3, %5 : vector<32x64xf32>
    %cst_5 = arith.constant 0.000000e+00 : f32
    %7 = vector.broadcast %cst_5 : f32 to vector<32x64xf32>
    %8 = arith.maximumf %6, %7 : vector<32x64xf32>
    %9 = arith.truncf %8 : vector<32x64xf32> to vector<32x64xbf16>
    %c0_6 = arith.constant 0 : index
    %c0_7 = arith.constant 0 : index
    %10 = vector.load %arg4[%c0_6, %c0_7] : memref<64x64xbf16, #tpu.memory_space<vmem>>, vector<64x64xbf16>
    %cst_8 = arith.constant dense<0.000000e+00> : vector<32x64xf32>
    %11 = tpu.matmul %9, %10, %cst_8 {dimension_numbers = #tpu.dot_dimension_numbers<[1], [0], [0], [1], [0, 0, 1, 1], [], []>} : vector<32x64xbf16>, vector<64x64xbf16>, vector<32x64xf32> -> vector<32x64xf32>
    %c0_9 = arith.constant 0 : index
    %c0_10 = arith.constant 0 : index
    %12 = vector.load %arg5[%c0_9, %c0_10] : memref<1x64xf32, #tpu.memory_space<vmem>>, vector<1x64xf32>
    %13 = vector.broadcast %12 : vector<1x64xf32> to vector<32x64xf32>
    %14 = arith.addf %11, %13 : vector<32x64xf32>
    %cst_11 = arith.constant 0.000000e+00 : f32
    %15 = vector.broadcast %cst_11 : f32 to vector<32x64xf32>
    %16 = arith.maximumf %14, %15 : vector<32x64xf32>
    %17 = arith.truncf %16 : vector<32x64xf32> to vector<32x64xbf16>
    %c0_12 = arith.constant 0 : index
    %c0_13 = arith.constant 0 : index
    %18 = vector.load %arg6[%c0_12, %c0_13] : memref<64x128xbf16, #tpu.memory_space<vmem>>, vector<64x128xbf16>
    %cst_14 = arith.constant dense<0.000000e+00> : vector<32x128xf32>
    %19 = tpu.matmul %17, %18, %cst_14 {dimension_numbers = #tpu.dot_dimension_numbers<[1], [0], [0], [1], [0, 0, 1, 1], [], []>} : vector<32x64xbf16>, vector<64x128xbf16>, vector<32x128xf32> -> vector<32x128xf32>
    %c0_15 = arith.constant 0 : index
    %c0_16 = arith.constant 0 : index
    %20 = vector.load %arg7[%c0_15, %c0_16] : memref<1x128xf32, #tpu.memory_space<vmem>>, vector<1x128xf32>
    %21 = vector.broadcast %20 : vector<1x128xf32> to vector<32x128xf32>
    %22 = arith.addf %19, %21 : vector<32x128xf32>
    %23 = arith.truncf %22 : vector<32x128xf32> to vector<32x128xbf16>
    %c0_17 = arith.constant 0 : index
    %c0_18 = arith.constant 0 : index
    %24 = vector.load %arg8[%c0_17, %c0_18] : memref<32x128xbf16, #tpu.memory_space<vmem>>, vector<32x128xbf16>
    tpu.vector_store %arg8[%c0_17, %c0_18], %23 {strides = array<i32>} : memref<32x128xbf16, #tpu.memory_space<vmem>>, vector<32x128xbf16>,
    return
  }
  func.func @transform_0(%arg0: i32) -> (i32, i32) {
    %c0_i32 = arith.constant 0 : i32
    %c0_i32_0 = arith.constant 0 : i32
    return %arg0, %c0_i32 : i32, i32
  }
  func.func @transform_1(%arg0: i32) -> (i32, i32) {
    %c0_i32 = arith.constant 0 : i32
    %c0_i32_0 = arith.constant 0 : i32
    %c0_i32_1 = arith.constant 0 : i32
    return %c0_i32, %c0_i32_0 : i32, i32
  }
  func.func @transform_2(%arg0: i32) -> (i32, i32) {
    %c0_i32 = arith.constant 0 : i32
    %c0_i32_0 = arith.constant 0 : i32
    %c0_i32_1 = arith.constant 0 : i32
    return %c0_i32, %c0_i32_0 : i32, i32
  }
  func.func @transform_3(%arg0: i32) -> (i32, i32) {
    %c0_i32 = arith.constant 0 : i32
    %c0_i32_0 = arith.constant 0 : i32
    %c0_i32_1 = arith.constant 0 : i32
    return %c0_i32, %c0_i32_0 : i32, i32
  }
  func.func @transform_4(%arg0: i32) -> (i32, i32) {
    %c0_i32 = arith.constant 0 : i32
    %c0_i32_0 = arith.constant 0 : i32
    %c0_i32_1 = arith.constant 0 : i32
    return %c0_i32, %c0_i32_0 : i32, i32
  }
  func.func @transform_5(%arg0: i32) -> (i32, i32) {
    %c0_i32 = arith.constant 0 : i32
    %c0_i32_0 = arith.constant 0 : i32
    %c0_i32_1 = arith.constant 0 : i32
    return %c0_i32, %c0_i32_0 : i32, i32
  }
  func.func @transform_6(%arg0: i32) -> (i32, i32) {
    %c0_i32 = arith.constant 0 : i32
    %c0_i32_0 = arith.constant 0 : i32
    %c0_i32_1 = arith.constant 0 : i32
    return %c0_i32, %c0_i32_0 : i32, i32
  }
  func.func @transform_7(%arg0: i32) -> (i32, i32) {
    %c0_i32 = arith.constant 0 : i32
    %c0_i32_0 = arith.constant 0 : i32
    return %arg0, %c0_i32 : i32, i32
  }
}

</mosaic_0001>

<bundles_post_ra>
// kernel: tpu_custom_call.1
= control target key start
LH: loop header
LB: loop body
LE: loop exit
PB: predicated region body
PF: predicated region fallthrough
CT: control target
= control target key end

     0   :  { %12 = vsyncpa [#allocation3], 0  ;;  %s1065_s0 = inlined_call_operand.vmem [shape: f32[64,32], index: 0, kind: input, shape index: {}]   ;;  %s1066_s1 = inlined_call_operand.vmem [shape: bf16[32,64], index: 1, kind: input, shape index: {}]   ;;  %s1067_s2 = inlined_call_operand.vmem [shape: f32[1,64], index: 2, kind: input, shape index: {}]   ;;  %s1068_s3 = inlined_call_operand.vmem [shape: bf16[64,64], index: 3, kind: input, shape index: {}]   ;;  %s1069_s4 = inlined_call_operand.vmem [shape: f32[1,64], index: 4, kind: input, shape index: {}]   ;;  %s1070_s5 = inlined_call_operand.vmem [shape: bf16[64,128], index: 5, kind: input, shape index: {}]   ;;  %s1071_s6 = inlined_call_operand.vmem [shape: f32[1,128], index: 6, kind: input, shape index: {}]   ;;  %s1072_s7 = inlined_call_operand.hbm [shape: bf16[64,128], index: 7, kind: output, shape index: {}]  }
   0x1   :  { %14 = vsyncpa [#allocation3 + $0x1], 0  ;;  %s920_s24 = smov 0   ;;  %s922_s25 = smov 0  }
   0x2   :  { %s924_s26 = smov 0   ;;  %s926_s27 = smov 0  }
   0x3 LB: > { %s941_s28 = sadd.s32 4294967295, %s875_s27   ;;  %s663_s29 = sadd.s32 4294967294, %s875_s27   ;;  %s875_s27 = sphi %s926_s27, %s1078_s27   ;;  %s871_s26 = sphi %s924_s26, %s1077_s26   ;;  %s867_s25 = sphi %s922_s25, %s1076_s25   ;;  %s863_s24 = sphi %s920_s24, %s1075_s24  }
   0x4   : > { %s945_s30 = sadd.s32 1, %s875_s27   ;;  %s179_s8 = sadd.s32 1, %s871_s26 }
   0x5   : > { %s176_s9 = ssub.s32 %s875_s27, %s945_s30  ;;  %p189_p0 = scmp.ne.s32.totalorder %s871_s26, %s867_s25 }
   0x6   : > { %p177_p1 = scmp.eq.s32.totalorder %s176_s9, 0  ;;  %p190_p2 = scmp.eq.s32.totalorder %s941_s28, 1 }
   0x7   : > { %p195_p3 = scmp.ne.s32.totalorder %s867_s25, %s863_s24  ;;  %p196_p4 = scmp.eq.s32.totalorder %s663_s29, 1 }
   0x8   : > { %s956_s10 = scalar_select %p177_p1, %s871_s26, %s179_s8  }
   0x9   : > { %p958_p5 = por %p190_p2, %p189_p0  ;;  %p962_p6 = por %p196_p4, %p195_p3 }
   0xa   : > { %p666_p7 = scmp.ge.s32.totalorder %s875_s27, 1  ;;  %p241_p8 = scmp.lt.s32.totalorder %s875_s27, 3 }
   0xc   : > { %p242_p9 = pnand %p666_p7, %p241_p8 }
   0xd   : > { %v803_v0 = vld [vmem:[%s1066_s1] sm:$0xff] (!%p242_p9)   ;;  %s668_s15 = sshll.u32 (!%p242_p9), %s941_s28, 2  ;;  %v804_v1 = vld [vmem:[%s1066_s1 + $0x8] sm:$0xff] (!%p242_p9)   ;;  %vm310_vm0 = vcmask (!%p242_p9), 261120   ;;  %v807_v10 = vld [vmem:[%s1068_s3 + $0x10] sm:$0xff] (!%p242_p9)   ;;  %vm411_vm1 = vcmask (!%p242_p9), 523264  }
   0xe   : > { %245 = sbr.rel (%p242_p9) target bundleno = 706 (0x2c2), region = 48  ;;  %p274_p10 = scmp.lt.s32.totalorder (!%p242_p9), %s668_s15, 7  ;;  %730 = vmatprep.subr.bf16.mxu0 (!%p242_p9), %v803_v0  ;;  %v805_v2 = vld [vmem:[%s1068_s3] sm:$0xff] (!%p242_p9)   ;;  %v806_v3 = vld [vmem:[%s1068_s3 + $0x8] sm:$0xff] (!%p242_p9)   ;;  %v808_v11 = vld [vmem:[%s1068_s3 + $0x18] sm:$0xff] (!%p242_p9)  }
   0xf   : > { %731 = vmatpush3.bf16.msra.mxu0 (!%p242_p9), %v803_v0  ;;  %738 = vmatprep.subr.bf16.mxu1 (!%p242_p9), %v805_v2  ;;  %v809_v12 = vld [vmem:[%s1070_s5] sm:$0xff] (!%p242_p9)   ;;  %v810_v13 = vld [vmem:[%s1070_s5 + $0x8] sm:$0xff] (!%p242_p9)   ;;  %v811_v29 = vld [vmem:[%s1070_s5 + $0x10] sm:$0xff] (!%p242_p9)   ;;  %s270_s14 = sand.u32 (!%p242_p9), 1, %s867_s25   ;;  %s702_s20 = sshll.u32 (!%p242_p9), %s941_s28, 8 }
  0x10   : > { %732 = vmatprep.subr.bf16.mxu0 (!%p242_p9), %v804_v1  ;;  %739 = vmatpush3.bf16.msra.mxu1 (!%p242_p9), %v805_v2  ;;  %v670_v14 = vld [vmem:[%s1067_s2] ss:$0 sm:$0xff] (!%p242_p9)  ;;  %v812_v30 = vld [vmem:[%s1070_s5 + $0x18] sm:$0xff] (!%p242_p9)   ;;  %s1022_s23 = scalar_lea.hbm (!%p242_p9), %s1072_s7, %s702_s20  ;;  %s1024_s28 = scalar_lea.sflag (!%p242_p9), [#allocation3], %s270_s14 }
  0x11   : > { %740 = vmatprep.subr.bf16.mxu1 (!%p242_p9), %v806_v3  ;;  %v675_v31 = vld [vmem:[%s1069_s4] ss:$0 sm:$0xff] (!%p242_p9) }
  0x12   : > { %v682_v47 = vld [vmem:[%s1071_s6] ss:$0 sm:$0xff] (!%p242_p9) }
  0x13   : > { %733 = vmatpush3.bf16.msra.mxu0 (!%p242_p9), %v804_v1 }
  0x14   : > { %741 = vmatpush3.bf16.msra.mxu1 (!%p242_p9), %v806_v3  ;;  %750 = vmatprep.subr.bf16.mxu0 (!%p242_p9), %v809_v12 }
  0x15   : > { %s1080_s15 = smov (!%p274_p10, %s668_s15), 7  ;;  %742 = vmatprep.subr.bf16.mxu1 %v807_v10 }
  0x16   : > { %s669_s22 = sshll.u32 %s1080_s15, 3  ;;  %s667_s15 = sshll.u32 %s270_s14, 4 }
  0x17   : > { %s277_s8 = scalar_lea.vmem %s1065_s0, %s669_s22  ;;  %s272_s18 = scalar_lea.vmem [#allocation2], %s667_s15 }
  0x18   : > { %v281_v4 = vld [vmem:[%s277_s8] sm:$0xff]  ;;  %v282_v5 = vld [vmem:[%s277_s8 + $0x8] sm:$0xff]  ;;  %v283_v6 = vld [vmem:[%s277_s8 + $0x10] sm:$0xff]  ;;  %743 = vmatpush3.bf16.msra.mxu1 %v807_v10  ;;  %s601_s19 = sshll.u32 %s272_s18, 4  ;;  %s1017_s19 = int_to_ptr.vmem [resolvable:$true] %s601_s19 }
  0x19   : > { %v285_v7 = vpack.c.bf16 %v282_v5, %v281_v4  ;;  %v284_v8 = vld [vmem:[%s277_s8 + $0x18] sm:$0xff]  ;;  %744 = vmatprep.subr.bf16.mxu1 %v808_v11  ;;  %s813_s29 = scalar_lea.vmem %s1017_s19, 256  ;;  %s877_s8 = smov [#allocation2]  }
  0x1a   : > { %v286_v9 = vpack.c.bf16 %v284_v8, %v283_v6  ;;  %p814_p11 = scmp.ne.s32.totalorder %s1017_s19, %s813_s29  ;;  %s817_s9 = sshll.u32 %s877_s8, 4  ;;  %s818_s9 = int_to_ptr.vmem [resolvable:$false] %s817_s9 }
  0x1b   : > { %734 = vmatprep.mubr.msk.bf16.mxu0 %vm310_vm0, %v285_v7  ;;  %s819_s13 = scalar_lea.vmem %s818_s9, 512  ;;  %p820_p0 = scmp.lt.s32.totalorder %s1017_s19, %s818_s9 }
  0x1c   : > { %735 = vmatmul.mubr.msk.bf16.vlgmr.msra.gmra.mrb[0].mxu0 %vm310_vm0, %v286_v9  ;;  %745 = vmatpush3.bf16.msra.mxu1 %v808_v11  ;;  %p815_p12 = pnand %p814_p11, %p958_p5  ;;  %p821_p1 = scmp.lt.s32.totalorder %s819_s13, %s813_s29 }
  0x1d   : > { %751 = vmatpush3.bf16.msra.mxu0 %v809_v12 }
  0x1e   : > { %752 = vmatprep.subr.bf16.mxu0 %v810_v13  ;;  %p816_p13 = pneg %p815_p12  ;;  %p822_p2 = por %p821_p1, %p820_p0 }
  0x20   : > { %p823_p3 = pnand %p822_p2, %p816_p13 }
  0x21   : > { %753 = vmatpush3.bf16.msra.mxu0 %v810_v13 }
  0x22   : > { %754 = vmatprep.subr.bf16.mxu0 %v811_v29 }
  0x25   : > { %755 = vmatpush3.bf16.msra.mxu0 %v811_v29 }
  0x26   : > { %756 = vmatprep.subr.bf16.mxu0 %v812_v30 }
  0x29   : > { %757 = vmatpush3.bf16.msra.mxu0 %v812_v30 }
  0xef   : > { %v736_v15 = vpop.f32.mrb[0].mxu0 }
  0xf0   : > { %v360_v16 = vadd.f32 %v736_v15, %v670_v14  ;;  %v351_v17 = vpop.f32.mrb[1].mxu0 }
  0xf1   : > { %v352_v18 = vadd.f32 %v670_v14, %v351_v17  ;;  %v737_v19 = vpop.f32.mrb[2].mxu0 }
  0xf2   : > { %v363_v20 = vadd.f32 %v737_v19, %v670_v14  ;;  %v354_v21 = vpop.f32.mrb[3].mxu0  ;;  %v368_v23 = vmax.f32 %v360_v16, 0.0 }
  0xf3   : > { %v355_v22 = vadd.f32 %v670_v14, %v354_v21  ;;  %v366_v25 = vmax.f32 %v352_v18, 0.0 }
  0xf4   : > { %v369_v24 = vmax.f32 %v363_v20, 0.0 }
  0xf5   : > { %v367_v26 = vmax.f32 %v355_v22, 0.0 }
  0xf6   : > { %v371_v27 = vpack.c.bf16 %v369_v24, %v368_v23 }
  0xf7   : > { %v370_v28 = vpack.c.bf16 %v367_v26, %v366_v25 }
  0xf9   : > { %746 = vmatprep.mubr.msk.bf16.mxu1 %vm411_vm1, %v370_v28 }
  0xfa   : > { %747 = vmatmul.mubr.msk.bf16.vlgmr.msra.gmra.mrb[0].mxu1 %vm411_vm1, %v371_v27 }
 0x1cd   : > { %v748_v32 = vpop.f32.mrb[0].mxu1 }
 0x1ce   : > { %v461_v33 = vadd.f32 %v748_v32, %v675_v31  ;;  %v452_v34 = vpop.f32.mrb[1].mxu1 }
 0x1cf   : > { %v453_v35 = vadd.f32 %v675_v31, %v452_v34  ;;  %v749_v36 = vpop.f32.mrb[2].mxu1 }
 0x1d0   : > { %v464_v37 = vadd.f32 %v749_v36, %v675_v31  ;;  %v455_v38 = vpop.f32.mrb[3].mxu1  ;;  %v469_v40 = vmax.f32 %v461_v33, 0.0 }
 0x1d1   : > { %v456_v39 = vadd.f32 %v675_v31, %v455_v38  ;;  %v467_v42 = vmax.f32 %v453_v35, 0.0 }
 0x1d2   : > { %v470_v41 = vmax.f32 %v464_v37, 0.0 }
 0x1d3   : > { %v468_v43 = vmax.f32 %v456_v39, 0.0 }
 0x1d4   : > { %v472_v44 = vpack.c.bf16 %v470_v41, %v469_v40 }
 0x1d5   : > { %v471_v45 = vpack.c.bf16 %v468_v43, %v467_v42 }
 0x1d7   : > { %758 = vmatprep.mubr.msk.bf16.mxu0 %vm411_vm1, %v471_v45 }
 0x1d8   : > { %759 = vmatmul.mubr.msk.bf16.vlgmr.msra.gmra.mrb[4].mxu0 %vm411_vm1, %v472_v44 }
 0x2ab   : > { %v760_v46 = vpop.f32.mrb[4].mxu0 }
 0x2ac   : > { %v552_v48 = vpop.f32.mrb[5].mxu0  ;;  %v561_v50 = vadd.f32 %v760_v46, %v682_v47 }
 0x2ad   : > { %v761_v49 = vpop.f32.mrb[6].mxu0  ;;  %v553_v53 = vadd.f32 %v682_v47, %v552_v48 }
 0x2ae   : > { %v564_v51 = vadd.f32 %v761_v49, %v682_v47  ;;  %v555_v52 = vpop.f32.mrb[7].mxu0 }
 0x2af   : > { %v556_v54 = vadd.f32 %v682_v47, %v555_v52 }
 0x2b0   : > { %v711_v55 = vpack.c.bf16 %v564_v51, %v561_v50 }
 0x2b1   : > { %v706_v56 = vpack.c.bf16 %v556_v54, %v553_v53 }
 0x2b2   : > { %713 = vst [vmem:[%s272_s18 + $0x8] sm:$0xff] %v711_v55  }
 0x2b3   : > { %707 = vst [vmem:[%s272_s18] sm:$0xff] %v706_v56  }
 0x2b4   : > { %826 = shalt.err (!%p823_p3)
}
 0x2b5   : > { %s827_s14 = scalar_lea.hbm %s1022_s23, 256  ;;  %s831_s17 = scalar_lea.hbm %s1072_s7, 512 }
 0x2b6   : > { %p828_p4 = scmp.ne.s32.totalorder %s1022_s23, %s827_s14  ;;  %p832_p9 = scmp.lt.u32.totalorder %s1022_s23, %s1072_s7 }
 0x2b7   : > { %p833_p10 = scmp.lt.u32.totalorder %s831_s17, %s827_s14  ;;  %p835_p12 = scmp.lt.u32.totalorder %s827_s14, %s1022_s23 }
 0x2b8   : > { %p829_p7 = pnand %p828_p4, %p958_p5 }
 0x2b9   : > { %p834_p11 = por %p833_p10, %p832_p9 }
 0x2ba   : > { %p830_p8 = pneg %p829_p7 }
 0x2bb   : > { %p836_p13 = por %p835_p12, %p834_p11 }
 0x2bd   : > { %p837_p0 = pnand %p836_p13, %p830_p8 }
 0x2bf   : > { %840 = shalt.err (!%p837_p0)
}
 0x2c0   : > { %s878_s21 = smov 64   ;;  %s879_s22 = smov 4  }
 0x2c1   : > { %762 = dma.vmem_to_hbm [thread:$0]  (%p958_p5), %s1017_s19, 256, %s1022_s23, %s1024_s28, %s878_s21, %s878_s21, %s879_s22  }
 0x2c2 PF: > { %p768_p1 = scmp.ge.s32.totalorder %s875_s27, 2  ;;  %s616_s29 = sand.u32 1, %s863_s24  }
 0x2c3   : > { %s617_s8 = scalar_lea.sflag [#allocation3], %s616_s29 }
 0x2c4   : > { %p765_p2 = pnand %p768_p1, %p962_p6 }
 0x2c6   : > { %858 = dma.done.wait (!%p765_p2), %s617_s8, 256  }
 0x2c7   : > { %860 = vsyncadd (!%p765_p2), %s617_s8, 4294967040  ;;  %p17_p3 = scmp.ge.s32.totalorder %s945_s30, 4   ;;  %s1075_s24 = smov %s867_s25 }
 0x2c8   : > { %s1076_s25 = smov %s871_s26  ;;  %s1077_s26 = smov %s956_s10 }
 0x2c9   : > { %s1078_s27 = smov %s945_s30  ;;  %19 = sbr.rel (!%p17_p3) target bundleno = 3 (0x3), region = 83 }
 0x2d0   :  { %622 = vsyncpa [#allocation3], 1 }
 0x2d1   :  { %624 = vsyncpa [#allocation3 + $0x1], 1 }

</bundles_post_ra>
